<compile_context>
chip_gen: v6e
topology: v6e:2x2x1
jax: 0.10.0
libtpu: 0.0.40
codegen_flags: <defaults>
</compile_context>

<pallas_src>
import jax
import jax.numpy as jnp
import numpy as np
from jax.experimental import pallas as pl
from jax.experimental.pallas import tpu as pltpu


def _round_up(x: int, m: int) -> int:
    return (x + m - 1) // m * m


def _mlp_kernel(x_ref, w1_ref, b1_ref, w2_ref, b2_ref,
                w3141_ref, b3141_ref, w3242_ref, bout_ref, out_ref):
    f32 = jnp.float32
    bf16 = jnp.bfloat16

    x = x_ref[...].astype(bf16)
    h1 = jnp.maximum(
        jnp.dot(x, w1_ref[...], preferred_element_type=f32) + b1_ref[...], 0.0)
    h2 = jnp.maximum(
        jnp.dot(h1.astype(bf16), w2_ref[...], preferred_element_type=f32)
        + b2_ref[...], 0.0)
    # Fused branch matmul: lanes [0:H) = h31 pre-act, [H:2H) = h41 pre-act.
    h34 = jnp.maximum(
        jnp.dot(h2.astype(bf16), w3141_ref[...], preferred_element_type=f32)
        + b3141_ref[...], 0.0)
    # Fused head matmul: K = 2H fills the MXU; col 0 = logit0, col 1 = logit1.
    logits = jnp.dot(h34.astype(bf16), w3242_ref[...],
                     preferred_element_type=f32)
    out_ref[...] = (logits[:, :2] + bout_ref[...]).astype(out_ref.dtype)


def inference_forward(x, params, *, block_b: int = 256):
    """Forward pass of the `Inference` module.

    x: (B, input_dim) float32.
    params: dict name -> (W, b) with W in PyTorch layout (out_features, in_features).
    Returns (B, 2): concat([logit0, logit1], axis=1).
    """
    B, input_dim = x.shape
    h_dim = params["fc1"][0].shape[0]

    H = _round_up(h_dim, 128)   # padded hidden dim (lane-aligned)
    OUTP = 128                  # lane-padded head-weight width (only cols 0/1 real)

    f32, bf16 = jnp.float32, jnp.bfloat16

    # Batch tile: sublane-aligned (f32 -> multiple of 8), up to block_b rows.
    tm = block_b if B >= block_b else _round_up(max(B, 1), 8)
    B_pad = _round_up(B, tm)

    def w_io(name):  # PyTorch (out, in) -> (in, out)
        return jnp.asarray(params[name][0], f32).T

    def b_row(name):
        return jnp.asarray(params[name][1], f32).reshape(1, -1)

    # fc1: x is NOT K-padded, so W1 is padded only on the output dim.
    w1 = jnp.pad(w_io("fc1"), ((0, 0), (0, H - h_dim))).astype(bf16)
    b1 = jnp.pad(b_row("fc1"), ((0, 0), (0, H - h_dim)))
    w2 = jnp.pad(w_io("fc2"), ((0, H - h_dim), (0, H - h_dim))).astype(bf16)
    b2 = jnp.pad(b_row("fc2"), ((0, 0), (0, H - h_dim)))

    # Fused branch weight (H, 2H): cols [0:H) from fc31, [H:2H) from fc41.
    w31 = jnp.pad(w_io("fc31"), ((0, H - h_dim), (0, H - h_dim)))
    w41 = jnp.pad(w_io("fc41"), ((0, H - h_dim), (0, H - h_dim)))
    w3141 = jnp.concatenate([w31, w41], axis=1).astype(bf16)
    b3141 = jnp.concatenate(
        [jnp.pad(b_row("fc31"), ((0, 0), (0, H - h_dim))),
         jnp.pad(b_row("fc41"), ((0, 0), (0, H - h_dim)))], axis=1)

    # Fused head weight (2H, OUTP): rows [0:H) (h31 part) feed col 0 (fc32),
    # rows [H:2H) (h41 part) feed col 1 (fc42).  Padded rows/cols stay zero.
    w32 = jnp.pad(w_io("fc32"), ((0, H - h_dim), (0, OUTP - 1)))
    w42 = jnp.pad(w_io("fc42"), ((0, H - h_dim), (1, OUTP - 2)))
    w3242 = jnp.concatenate([w32, w42], axis=0).astype(bf16)
    bout = jnp.concatenate([jnp.asarray(params["fc32"][1], f32),
                            jnp.asarray(params["fc42"][1], f32)]).reshape(1, 2)

    # Only the batch dim of x is padded (to a tile multiple); features untouched.
    x_pad = jnp.pad(jnp.asarray(x, f32), ((0, B_pad - B), (0, 0)))

    # VMEM accounting: the default pipeline double-buffers EVERY operand, so
    # the real footprint is ~2x the per-buffer bytes.  Budget conservatively
    # for v7x (64 MiB physical, 32 MiB scoped default).
    per_buf_bytes = (
        tm * input_dim * 4                                  # x tile (f32)
        + (input_dim * H + H * H + H * 2 * H + 2 * H * OUTP) * 2   # bf16 weights
        + (H + H + 2 * H + 2) * 4                           # f32 biases
        + tm * 2 * 4                                        # out tile (f32)
    )
    vmem_estimate = 2 * per_buf_bytes
    assert vmem_estimate < 28 * 1024 * 1024, (
        "h_dim too large for the resident-weight plan (double-buffered VMEM)")
    # TODO(synk): for very large h_dim, switch to an H/N-tiled variant with an
    # f32 VMEM accumulator scratch instead of full weight residency.

    flops = 2 * B_pad * (input_dim * H + H * H + H * 2 * H + 2 * H * OUTP)
    bytes_accessed = (
        B_pad * input_dim * 4
        + (input_dim * H + H * H + H * 2 * H + 2 * H * OUTP) * 2
        + (4 * H + 2) * 4
        + B_pad * 2 * 4)

    resident = lambda i: (0, 0)  # noqa: E731 — weight blocks fixed across batch tiles

    out = pl.pallas_call(
        _mlp_kernel,
        out_shape=jax.ShapeDtypeStruct((B_pad, 2), f32),
        grid=(B_pad // tm,),
        in_specs=[
            pl.BlockSpec((tm, input_dim), lambda i: (i, 0)),  # x tile (unpadded K)
            pl.BlockSpec((input_dim, H), resident),           # W1
            pl.BlockSpec((1, H), resident),                   # b1
            pl.BlockSpec((H, H), resident),                   # W2
            pl.BlockSpec((1, H), resident),                   # b2
            pl.BlockSpec((H, 2 * H), resident),               # W31|W41 fused
            pl.BlockSpec((1, 2 * H), resident),               # b31|b41 fused
            pl.BlockSpec((2 * H, OUTP), resident),            # [W32;W42] fused head
            pl.BlockSpec((1, 2), resident),                   # [b32, b42]
        ],
        out_specs=pl.BlockSpec((tm, 2), lambda i: (i, 0)),
        compiler_params=pltpu.CompilerParams(
            dimension_semantics=("parallel",),   # shards batch tiles on v7x's 2 TCs
            vmem_limit_bytes=32 * 1024 * 1024),
        cost_estimate=pl.CostEstimate(flops=flops, transcendentals=0,
                                      bytes_accessed=bytes_accessed),
    )(x_pad, w1, b1, w2, b2, w3141, b3141, w3242, bout)

    return out[:B]


def inference_reference(x, params):
    """Pure-JAX f32 reference matching the PyTorch module semantics."""
    def lin(h, name):
        W, b = params[name]
        return h @ jnp.asarray(W).T + jnp.asarray(b)

    h1 = jax.nn.relu(lin(x, "fc1"))
    h2 = jax.nn.relu(lin(h1, "fc2"))
    h31 = jax.nn.relu(lin(h2, "fc31"))
    logit0 = lin(h31, "fc32")
    h41 = jax.nn.relu(lin(h2, "fc41"))
    logit1 = lin(h41, "fc42")
    return jnp.concatenate([logit0, logit1], axis=1)


if __name__ == "__main__":
    key = jax.random.PRNGKey(0)
    B, input_dim, h_dim = 4, 10, 32
    ks = jax.random.split(key, 16)

    def xavier(k, fan_out, fan_in):
        std = (2.0 / (fan_in + fan_out)) ** 0.5
        return std * jax.random.normal(k, (fan_out, fan_in), jnp.float32)

    def bias(k, n):
        return 0.1 * jax.random.normal(k, (n,), jnp.float32)

    params = {
        "fc1":  (xavier(ks[0], h_dim, input_dim), bias(ks[6], h_dim)),
        "fc2":  (xavier(ks[1], h_dim, h_dim),     bias(ks[7], h_dim)),
        "fc31": (xavier(ks[2], h_dim, h_dim),     bias(ks[8], h_dim)),
        "fc32": (xavier(ks[3], 1, h_dim),         bias(ks[9], 1)),
        "fc41": (xavier(ks[4], h_dim, h_dim),     bias(ks[10], h_dim)),
        "fc42": (xavier(ks[5], 1, h_dim),         bias(ks[11], 1)),
    }
    x = jax.random.normal(ks[12], (B, input_dim), jnp.float32)

    out = jax.block_until_ready(inference_forward(x, params))
    ref = inference_reference(x, params)

    assert out.shape == (B, 2), out.shape
    # bf16 MXU operands with f32 accumulation -> relaxed tolerance (per review).
    np.testing.assert_allclose(np.asarray(out), np.asarray(ref),
                               rtol=2e-2, atol=2e-2)
    print("KERNEL_OK")
</pallas_src>

<mosaic_0001>
module attributes {stable_mosaic.version = 11 : i64} {
  func.func @_mlp_kernel(%arg0: i32, %arg1: memref<8x10xf32, #tpu.memory_space<vmem>>, %arg2: memref<10x128xbf16, #tpu.memory_space<vmem>>, %arg3: memref<1x128xf32, #tpu.memory_space<vmem>>, %arg4: memref<128x128xbf16, #tpu.memory_space<vmem>>, %arg5: memref<1x128xf32, #tpu.memory_space<vmem>>, %arg6: memref<128x256xbf16, #tpu.memory_space<vmem>>, %arg7: memref<1x256xf32, #tpu.memory_space<vmem>>, %arg8: memref<256x128xbf16, #tpu.memory_space<vmem>>, %arg9: memref<1x2xf32, #tpu.memory_space<vmem>>, %arg10: memref<8x2xf32, #tpu.memory_space<vmem>>) attributes {dimension_semantics = [#tpu.dimension_semantics<parallel>], iteration_bounds = array<i64: 1>, scalar_prefetch = 0 : i64, scratch_operands = 0 : i64, tpu.core_type = #tpu.core_type<tc>, window_params = [{transform_indices = @transform_0, window_bounds = array<i64: 8, 10>}, {pipeline_mode = #tpu.pipeline_mode<synchronous>, transform_indices = @transform_1, window_bounds = array<i64: 10, 128>}, {pipeline_mode = #tpu.pipeline_mode<synchronous>, transform_indices = @transform_2, window_bounds = array<i64: 1, 128>}, {pipeline_mode = #tpu.pipeline_mode<synchronous>, transform_indices = @transform_3, window_bounds = array<i64: 128, 128>}, {pipeline_mode = #tpu.pipeline_mode<synchronous>, transform_indices = @transform_4, window_bounds = array<i64: 1, 128>}, {pipeline_mode = #tpu.pipeline_mode<synchronous>, transform_indices = @transform_5, window_bounds = array<i64: 128, 256>}, {pipeline_mode = #tpu.pipeline_mode<synchronous>, transform_indices = @transform_6, window_bounds = array<i64: 1, 256>}, {pipeline_mode = #tpu.pipeline_mode<synchronous>, transform_indices = @transform_7, window_bounds = array<i64: 256, 128>}, {pipeline_mode = #tpu.pipeline_mode<synchronous>, transform_indices = @transform_8, window_bounds = array<i64: 1, 2>}, {transform_indices = @transform_9, window_bounds = array<i64: 8, 2>}]} {
    %c0 = arith.constant 0 : index
    %c0_0 = arith.constant 0 : index
    %0 = vector.load %arg1[%c0, %c0_0] : memref<8x10xf32, #tpu.memory_space<vmem>>, vector<8x10xf32>
    %1 = arith.truncf %0 : vector<8x10xf32> to vector<8x10xbf16>
    %c0_1 = arith.constant 0 : index
    %c0_2 = arith.constant 0 : index
    %2 = vector.load %arg2[%c0_1, %c0_2] : memref<10x128xbf16, #tpu.memory_space<vmem>>, vector<10x128xbf16>
    %cst = arith.constant dense<0.000000e+00> : vector<8x128xf32>
    %3 = tpu.matmul %1, %2, %cst {dimension_numbers = #tpu.dot_dimension_numbers<[1], [0], [0], [1], [0, 0, 1, 1], [], []>} : vector<8x10xbf16>, vector<10x128xbf16>, vector<8x128xf32> -> vector<8x128xf32>
    %c0_3 = arith.constant 0 : index
    %c0_4 = arith.constant 0 : index
    %4 = vector.load %arg3[%c0_3, %c0_4] : memref<1x128xf32, #tpu.memory_space<vmem>>, vector<1x128xf32>
    %5 = vector.broadcast %4 : vector<1x128xf32> to vector<8x128xf32>
    %6 = arith.addf %3, %5 : vector<8x128xf32>
    %cst_5 = arith.constant 0.000000e+00 : f32
    %7 = vector.broadcast %cst_5 : f32 to vector<8x128xf32>
    %8 = arith.maximumf %6, %7 : vector<8x128xf32>
    %9 = arith.truncf %8 : vector<8x128xf32> to vector<8x128xbf16>
    %c0_6 = arith.constant 0 : index
    %c0_7 = arith.constant 0 : index
    %10 = vector.load %arg4[%c0_6, %c0_7] : memref<128x128xbf16, #tpu.memory_space<vmem>>, vector<128x128xbf16>
    %cst_8 = arith.constant dense<0.000000e+00> : vector<8x128xf32>
    %11 = tpu.matmul %9, %10, %cst_8 {dimension_numbers = #tpu.dot_dimension_numbers<[1], [0], [0], [1], [0, 0, 1, 1], [], []>} : vector<8x128xbf16>, vector<128x128xbf16>, vector<8x128xf32> -> vector<8x128xf32>
    %c0_9 = arith.constant 0 : index
    %c0_10 = arith.constant 0 : index
    %12 = vector.load %arg5[%c0_9, %c0_10] : memref<1x128xf32, #tpu.memory_space<vmem>>, vector<1x128xf32>
    %13 = vector.broadcast %12 : vector<1x128xf32> to vector<8x128xf32>
    %14 = arith.addf %11, %13 : vector<8x128xf32>
    %cst_11 = arith.constant 0.000000e+00 : f32
    %15 = vector.broadcast %cst_11 : f32 to vector<8x128xf32>
    %16 = arith.maximumf %14, %15 : vector<8x128xf32>
    %17 = arith.truncf %16 : vector<8x128xf32> to vector<8x128xbf16>
    %c0_12 = arith.constant 0 : index
    %c0_13 = arith.constant 0 : index
    %18 = vector.load %arg6[%c0_12, %c0_13] : memref<128x256xbf16, #tpu.memory_space<vmem>>, vector<128x256xbf16>
    %cst_14 = arith.constant dense<0.000000e+00> : vector<8x256xf32>
    %19 = tpu.matmul %17, %18, %cst_14 {dimension_numbers = #tpu.dot_dimension_numbers<[1], [0], [0], [1], [0, 0, 1, 1], [], []>} : vector<8x128xbf16>, vector<128x256xbf16>, vector<8x256xf32> -> vector<8x256xf32>
    %c0_15 = arith.constant 0 : index
    %c0_16 = arith.constant 0 : index
    %20 = vector.load %arg7[%c0_15, %c0_16] : memref<1x256xf32, #tpu.memory_space<vmem>>, vector<1x256xf32>
    %21 = vector.broadcast %20 : vector<1x256xf32> to vector<8x256xf32>
    %22 = arith.addf %19, %21 : vector<8x256xf32>
    %cst_17 = arith.constant 0.000000e+00 : f32
    %23 = vector.broadcast %cst_17 : f32 to vector<8x256xf32>
    %24 = arith.maximumf %22, %23 : vector<8x256xf32>
    %25 = arith.truncf %24 : vector<8x256xf32> to vector<8x256xbf16>
    %c0_18 = arith.constant 0 : index
    %c0_19 = arith.constant 0 : index
    %26 = vector.load %arg8[%c0_18, %c0_19] : memref<256x128xbf16, #tpu.memory_space<vmem>>, vector<256x128xbf16>
    %cst_20 = arith.constant dense<0.000000e+00> : vector<8x128xf32>
    %27 = tpu.matmul %25, %26, %cst_20 {dimension_numbers = #tpu.dot_dimension_numbers<[1], [0], [0], [1], [0, 0, 1, 1], [], []>} : vector<8x256xbf16>, vector<256x128xbf16>, vector<8x128xf32> -> vector<8x128xf32>
    %28 = vector.extract_strided_slice %27 {offsets = [0, 0], sizes = [8, 2], strides = [1, 1]} : vector<8x128xf32> to vector<8x2xf32>
    %c0_21 = arith.constant 0 : index
    %c0_22 = arith.constant 0 : index
    %29 = vector.load %arg9[%c0_21, %c0_22] : memref<1x2xf32, #tpu.memory_space<vmem>>, vector<1x2xf32>
    %30 = vector.broadcast %29 : vector<1x2xf32> to vector<8x2xf32>
    %31 = arith.addf %28, %30 : vector<8x2xf32>
    %c0_23 = arith.constant 0 : index
    %c0_24 = arith.constant 0 : index
    %32 = vector.load %arg10[%c0_23, %c0_24] : memref<8x2xf32, #tpu.memory_space<vmem>>, vector<8x2xf32>
    tpu.vector_store %arg10[%c0_23, %c0_24], %31 {strides = array<i32>} : memref<8x2xf32, #tpu.memory_space<vmem>>, vector<8x2xf32>,
    return
  }
  func.func @transform_0(%arg0: i32) -> (i32, i32) {
    %c0_i32 = arith.constant 0 : i32
    %c0_i32_0 = arith.constant 0 : i32
    return %arg0, %c0_i32 : i32, i32
  }
  func.func @transform_1(%arg0: i32) -> (i32, i32) {
    %c0_i32 = arith.constant 0 : i32
    %c0_i32_0 = arith.constant 0 : i32
    %c0_i32_1 = arith.constant 0 : i32
    return %c0_i32, %c0_i32_0 : i32, i32
  }
  func.func @transform_2(%arg0: i32) -> (i32, i32) {
    %c0_i32 = arith.constant 0 : i32
    %c0_i32_0 = arith.constant 0 : i32
    %c0_i32_1 = arith.constant 0 : i32
    return %c0_i32, %c0_i32_0 : i32, i32
  }
  func.func @transform_3(%arg0: i32) -> (i32, i32) {
    %c0_i32 = arith.constant 0 : i32
    %c0_i32_0 = arith.constant 0 : i32
    %c0_i32_1 = arith.constant 0 : i32
    return %c0_i32, %c0_i32_0 : i32, i32
  }
  func.func @transform_4(%arg0: i32) -> (i32, i32) {
    %c0_i32 = arith.constant 0 : i32
    %c0_i32_0 = arith.constant 0 : i32
    %c0_i32_1 = arith.constant 0 : i32
    return %c0_i32, %c0_i32_0 : i32, i32
  }
  func.func @transform_5(%arg0: i32) -> (i32, i32) {
    %c0_i32 = arith.constant 0 : i32
    %c0_i32_0 = arith.constant 0 : i32
    %c0_i32_1 = arith.constant 0 : i32
    return %c0_i32, %c0_i32_0 : i32, i32
  }
  func.func @transform_6(%arg0: i32) -> (i32, i32) {
    %c0_i32 = arith.constant 0 : i32
    %c0_i32_0 = arith.constant 0 : i32
    %c0_i32_1 = arith.constant 0 : i32
    return %c0_i32, %c0_i32_0 : i32, i32
  }
  func.func @transform_7(%arg0: i32) -> (i32, i32) {
    %c0_i32 = arith.constant 0 : i32
    %c0_i32_0 = arith.constant 0 : i32
    %c0_i32_1 = arith.constant 0 : i32
    return %c0_i32, %c0_i32_0 : i32, i32
  }
  func.func @transform_8(%arg0: i32) -> (i32, i32) {
    %c0_i32 = arith.constant 0 : i32
    %c0_i32_0 = arith.constant 0 : i32
    %c0_i32_1 = arith.constant 0 : i32
    return %c0_i32, %c0_i32_0 : i32, i32
  }
  func.func @transform_9(%arg0: i32) -> (i32, i32) {
    %c0_i32 = arith.constant 0 : i32
    %c0_i32_0 = arith.constant 0 : i32
    return %arg0, %c0_i32 : i32, i32
  }
}

</mosaic_0001>

<bundles_post_ra>
// kernel: tpu_custom_call.1
= control target key start
LH: loop header
LB: loop body
LE: loop exit
PB: predicated region body
PF: predicated region fallthrough
CT: control target
= control target key end

     0   :  { %14 = vsyncpa [#allocation3], 0  ;;  %s988_s0 = inlined_call_operand.hbm [shape: f32[8,10], index: 0, kind: input, shape index: {}]   ;;  %s989_s1 = inlined_call_operand.hbm [shape: bf16[10,128], index: 1, kind: input, shape index: {}]   ;;  %s990_s2 = inlined_call_operand.vmem [shape: f32[1,128], index: 2, kind: input, shape index: {}]   ;;  %s991_s3 = inlined_call_operand.hbm [shape: bf16[128,128], index: 3, kind: input, shape index: {}]   ;;  %s992_s4 = inlined_call_operand.vmem [shape: f32[1,128], index: 4, kind: input, shape index: {}]   ;;  %s993_s5 = inlined_call_operand.hbm [shape: bf16[128,256], index: 5, kind: input, shape index: {}]   ;;  %s994_s6 = inlined_call_operand.vmem [shape: f32[1,256], index: 6, kind: input, shape index: {}]   ;;  %s995_s7 = inlined_call_operand.hbm [shape: bf16[256,128], index: 7, kind: input, shape index: {}]   ;;  %s996_s8 = inlined_call_operand.vmem [shape: f32[1,2], index: 8, kind: input, shape index: {}]   ;;  %s997_s9 = inlined_call_operand.vmem [shape: f32[8,2], index: 9, kind: output, shape index: {}]  }
   0x1   :  { %15 = vsyncpa [#allocation5], 0 }
   0x2   :  { %16 = vsyncpa [#allocation8], 0  ;;  %s887_s30 = smov [#allocation4]  }
   0x3   :  { %s32_s10 = sshll.u32 %s887_s30, 4  ;;  %s33_s10 = int_to_ptr.vmem [resolvable:$true] %s32_s10 }
   0x4   :  { %s789_s11 = scalar_lea.vmem %s33_s10, 128  ;;  %p794_p1 = scmp.lt.s32.totalorder %s33_s10, %s33_s10 }
   0x5   :  { %p790_p0 = scmp.ne.s32.totalorder %s33_s10, %s789_s11  ;;  %p795_p2 = scmp.lt.s32.totalorder %s789_s11, %s789_s11 }
   0x7   :  { %p796_p3 = por %p795_p2, %p794_p1 }
   0x9   :  { %p797_p4 = pnand %p796_p3, %p790_p0 }
   0xb   :  { %800 = shalt.err (!%p797_p4)
}
   0xc   :  { %s888_s12 = smov 64   ;;  %s889_s13 = smov 4  }
   0xd   :  { %38 = dma.hbm_to_vmem [thread:$0]  %s989_s1, 128, %s33_s10, [#allocation5], %s888_s12, %s888_s12, %s889_s13  }
   0xe   :  { %s890_s16 = smov [#allocation7]  }
   0xf   :  { %s60_s17 = sshll.u32 %s890_s16, 4  ;;  %s61_s17 = int_to_ptr.vmem [resolvable:$true] %s60_s17 }
  0x10   :  { %s809_s18 = scalar_lea.vmem %s61_s17, 2048  ;;  %p814_p6 = scmp.lt.s32.totalorder %s61_s17, %s61_s17 }
  0x11   :  { %p810_p5 = scmp.ne.s32.totalorder %s61_s17, %s809_s18  ;;  %p815_p7 = scmp.lt.s32.totalorder %s809_s18, %s809_s18 }
  0x13   :  { %p816_p8 = por %p815_p7, %p814_p6 }
  0x15   :  { %p817_p9 = pnand %p816_p8, %p810_p5 }
  0x17   :  { %820 = shalt.err (!%p817_p9)
}
  0x18   :  { %s891_s19 = smov 128   ;;  %s892_s20 = smov 8  }
  0x19   :  { %66 = dma.hbm_to_vmem [thread:$0]  %s993_s5, 2048, %s61_s17, [#allocation8], %s891_s19, %s891_s19, %s892_s20  }
  0x1a   :  { %s893_s23 = smov [#allocation2]   ;;  %s894_s25 = smov [#allocation6]  }
  0x1b   :  { %s23_s24 = sshll.u32 %s893_s23, 4  ;;  %s46_s1 = sshll.u32 %s894_s25, 4  ;;  %s24_s24 = int_to_ptr.vmem [resolvable:$true] %s23_s24  ;;  %s47_s1 = int_to_ptr.vmem [resolvable:$true] %s46_s1 }
  0x1c   :  { %s829_s26 = scalar_lea.vmem %s24_s24, 128  ;;  %p834_p11 = scmp.lt.s32.totalorder %s24_s24, %s24_s24 }
  0x1d   :  { %p830_p10 = scmp.ne.s32.totalorder %s24_s24, %s829_s26  ;;  %p835_p12 = scmp.lt.s32.totalorder %s829_s26, %s829_s26 }
  0x1f   :  { %p836_p13 = por %p835_p12, %p834_p11 }
  0x21   :  { %p837_p0 = pnand %p836_p13, %p830_p10 }
  0x23   :  { %840 = shalt.err (!%p837_p0)
}
  0x24   :  { %26 = dma.hbm_to_vmem [thread:$0]  %s988_s0, 128, %s24_s24, [#allocation3]  }
  0x25   :  { %s849_s29 = scalar_lea.vmem %s47_s1, 1024  ;;  %p854_p2 = scmp.lt.s32.totalorder %s47_s1, %s47_s1 }
  0x26   :  { %p850_p1 = scmp.ne.s32.totalorder %s47_s1, %s849_s29  ;;  %p855_p3 = scmp.lt.s32.totalorder %s849_s29, %s849_s29 }
  0x28   :  { %p856_p4 = por %p855_p3, %p854_p2 }
  0x2a   :  { %p857_p5 = pnand %p856_p4, %p850_p1 }
  0x2c   :  { %860 = shalt.err (!%p857_p5)
}
  0x2d   :  { %52 = dma.hbm_to_vmem [thread:$0]  %s991_s3, 1024, %s47_s1, [#allocation5], %s888_s12, %s888_s12, %s889_s13  }
  0x2e   :  { %s895_s10 = smov [#allocation9]  }
  0x2f   :  { %s74_s11 = sshll.u32 %s895_s10, 4  ;;  %s75_s11 = int_to_ptr.vmem [resolvable:$true] %s74_s11 }
  0x30   :  { %s869_s14 = scalar_lea.vmem %s75_s11, 2048  ;;  %p874_p7 = scmp.lt.s32.totalorder %s75_s11, %s75_s11 }
  0x31   :  { %p870_p6 = scmp.ne.s32.totalorder %s75_s11, %s869_s14  ;;  %p875_p8 = scmp.lt.s32.totalorder %s869_s14, %s869_s14 }
  0x33   :  { %p876_p9 = por %p875_p8, %p874_p7 }
  0x35   :  { %p877_p10 = pnand %p876_p9, %p870_p6 }
  0x37   :  { %880 = shalt.err (!%p877_p10)
}
  0x38   :  { %80 = dma.hbm_to_vmem [thread:$0]  %s995_s7, 2048, %s75_s11, [#allocation8], %s888_s12, %s888_s12, %s889_s13  }
  0x39   :  { %881 = dma.done.wait [#allocation3], 128  }
  0x3a   :  { %882 = vsyncadd [#allocation3], 4294967168 }
  0x3b   :  { %883 = dma.done.wait [#allocation5], 1152  }
  0x3c   :  { %884 = vsyncadd [#allocation5], 4294966144 }
  0x3d   :  { %885 = dma.done.wait [#allocation8], 4096  }
  0x3e   :  { %886 = vsyncadd [#allocation8], 4294963200  ;;  %v896_v0 = vmov 0.0   ;;  %vm897_vm0 = vmmov 0   ;;  %vm119_vm1 = vcmask 1044480   ;;  %v99_v2 = vld [vmem:[#allocation2] sm:$0xff]  ;;  %v296_v62 = vlaneseq }
  0x3f   :  { %694 = vmatprep.subr.bf16.mxu0 %v896_v0  ;;  %696 = vmatprep.mubr.msk.bf16.mxu0 %vm897_vm0, %v896_v0  ;;  %v732_v1 = vld [vmem:[#allocation4] sm:$0x1f]   ;;  %v100_v4 = vpack.c.bf16 %v99_v2, %v99_v2  ;;  %vm115_vm2 = vcmask 80896   ;;  %v734_v6 = vld [vmem:[#allocation6 + $0x30] sm:$0xff]   ;;  %v735_v7 = vld [vmem:[#allocation6 + $0x28] sm:$0xff]   ;;  %v898_v37 = vmov 0  }
  0x40   :  { %700 = vmatprep.subr.bf16.mxu1 %v896_v0  ;;  %716 = vmatprep.mubr.msk.bf16.mxu1 %vm897_vm0, %v896_v0  ;;  %v121_v3 = vsel %vm119_vm1, %v732_v1, 0  ;;  %v733_v5 = vld [vmem:[#allocation6 + $0x38] sm:$0xff]   ;;  %v736_v8 = vld [vmem:[#allocation6 + $0x20] sm:$0xff]   ;;  %v738_v10 = vld [vmem:[#allocation6 + $0x10] sm:$0xff]   ;;  %v297_v63 = vshrl.u32 %v296_v62, 7  ;;  %vm607_vm3 = vcmask 15360  }
  0x41   :  { %695 = vmatpush3.bf16.msra.mxu0 %v121_v3  ;;  %701 = vmatpush3.bf16.msra.mxu1 %v733_v5  ;;  %v737_v9 = vld [vmem:[#allocation6 + $0x18] sm:$0xff]   ;;  %v739_v11 = vld [vmem:[#allocation6 + $0x8] sm:$0xff]   ;;  %v740_v12 = vld [vmem:[#allocation6] sm:$0xff]  }
  0x42   :  { %702 = vmatprep.subr.bf16.mxu1 %v896_v0  ;;  %v741_v13 = vld [vmem:[#allocation7 + $0x70] ss:$8 sps:$4 sm:$0xff]   ;;  %v743_v14 = vld [vmem:[#allocation7 + $0x74] ss:$8 sps:$4 sm:$0xff]   ;;  %v746_v15 = vld [vmem:[#allocation7 + $0x64] ss:$8 sps:$4 sm:$0xff]  }
  0x43   :  { %386 = vmatprep.subr.bf16.mxu0 %v743_v14  ;;  %v744_v16 = vld [vmem:[#allocation7 + $0x60] ss:$8 sps:$4 sm:$0xff]   ;;  %v749_v17 = vld [vmem:[#allocation7 + $0x54] ss:$8 sps:$4 sm:$0xff]   ;;  %v747_v18 = vld [vmem:[#allocation7 + $0x50] ss:$8 sps:$4 sm:$0xff]  }
  0x44   :  { %697 = vmatmul.mubr.msk.bf16.vlgmr.msra.gmra.mxu0 %vm115_vm2, %v100_v4  ;;  %v752_v19 = vld [vmem:[#allocation7 + $0x44] ss:$8 sps:$4 sm:$0xff]   ;;  %v750_v20 = vld [vmem:[#allocation7 + $0x40] ss:$8 sps:$4 sm:$0xff]   ;;  %v755_v21 = vld [vmem:[#allocation7 + $0x34] ss:$8 sps:$4 sm:$0xff]  }
  0x45   :  { %703 = vmatpush3.bf16.msra.mxu1 %v734_v6  ;;  %387 = vmatpush1.bf16.msra.mxu0 %v741_v13  ;;  %v753_v22 = vld [vmem:[#allocation7 + $0x30] ss:$8 sps:$4 sm:$0xff]   ;;  %v758_v23 = vld [vmem:[#allocation7 + $0x24] ss:$8 sps:$4 sm:$0xff]   ;;  %v756_v24 = vld [vmem:[#allocation7 + $0x20] ss:$8 sps:$4 sm:$0xff]  }
  0x46   :  { %704 = vmatprep.subr.bf16.mxu1 %v896_v0  ;;  %388 = vmatprep.subr.bf16.mxu0 %v746_v15  ;;  %v761_v25 = vld [vmem:[#allocation7 + $0x14] ss:$8 sps:$4 sm:$0xff]   ;;  %v759_v26 = vld [vmem:[#allocation7 + $0x10] ss:$8 sps:$4 sm:$0xff]   ;;  %v764_v35 = vld [vmem:[#allocation7 + $0x4] ss:$8 sps:$4 sm:$0xff]  }
  0x47   :  { %v616_v27 = vld [vmem:[%s990_s2] ss:$0 sm:$0xff]  ;;  %v762_v36 = vld [vmem:[#allocation7] ss:$8 sps:$4 sm:$0xff]   ;;  %418 = vmatprep.mubr.bf16.mxu0 %v898_v37  ;;  %v765_v38 = vld [vmem:[#allocation9 + $0x78] sm:$0xff]   ;;  %v302_v2 = vsub.s32 1, %v297_v63 }
  0x48   :  { %v766_v39 = vld [vmem:[#allocation9 + $0x38] sm:$0xff]   ;;  %v767_v40 = vld [vmem:[#allocation9 + $0x70] sm:$0xff]   ;;  %v769_v42 = vld [vmem:[#allocation9 + $0x68] sm:$0xff]  }
  0x49   :  { %705 = vmatpush3.bf16.msra.mxu1 %v735_v7  ;;  %389 = vmatpush1.bf16.msra.mxu0 %v744_v16  ;;  %v768_v41 = vld [vmem:[#allocation9 + $0x30] sm:$0xff]   ;;  %v770_v43 = vld [vmem:[#allocation9 + $0x28] sm:$0xff]   ;;  %v771_v44 = vld [vmem:[#allocation9 + $0x60] sm:$0xff]  }
  0x4a   :  { %706 = vmatprep.subr.bf16.mxu1 %v896_v0  ;;  %390 = vmatprep.subr.bf16.mxu0 %v749_v17  ;;  %v772_v45 = vld [vmem:[#allocation9 + $0x20] sm:$0xff]   ;;  %v773_v46 = vld [vmem:[#allocation9 + $0x58] sm:$0xff]   ;;  %v775_v48 = vld [vmem:[#allocation9 + $0x50] sm:$0xff]  }
  0x4b   :  { %v774_v47 = vld [vmem:[#allocation9 + $0x18] sm:$0xff]   ;;  %v776_v49 = vld [vmem:[#allocation9 + $0x10] sm:$0xff]   ;;  %v777_v58 = vld [vmem:[#allocation9 + $0x48] sm:$0xff]  }
  0x4c   :  { %v619_v50 = vld [vmem:[%s992_s4] ss:$0 sm:$0xff]  ;;  %v778_v59 = vld [vmem:[#allocation9 + $0x8] sm:$0xff]   ;;  %v779_v60 = vld [vmem:[#allocation9 + $0x40] sm:$0xff]  }
  0x4d   :  { %707 = vmatpush3.bf16.msra.mxu1 %v736_v8  ;;  %391 = vmatpush1.bf16.msra.mxu0 %v747_v18  ;;  %v780_v61 = vld [vmem:[#allocation9] sm:$0xff]   ;;  %v294_v1 = vld [vmem:[%s994_s6] sm:$0x3] }
  0x4e   :  { %708 = vmatprep.subr.bf16.mxu1 %v896_v0  ;;  %392 = vmatprep.subr.bf16.mxu0 %v752_v19  ;;  %v303_v4 = vrot.slane %v294_v1, %v302_v2  ;;  %v660_v17 = vld [vmem:[%s996_s8] ss:$0 sm:$0xff] }
  0x51   :  { %709 = vmatpush3.bf16.msra.mxu1 %v737_v9  ;;  %393 = vmatpush1.bf16.msra.mxu0 %v750_v20 }
  0x52   :  { %710 = vmatprep.subr.bf16.mxu1 %v896_v0  ;;  %394 = vmatprep.subr.bf16.mxu0 %v755_v21 }
  0x55   :  { %711 = vmatpush3.bf16.msra.mxu1 %v738_v10  ;;  %395 = vmatpush1.bf16.msra.mxu0 %v753_v22 }
  0x56   :  { %712 = vmatprep.subr.bf16.mxu1 %v896_v0  ;;  %396 = vmatprep.subr.bf16.mxu0 %v758_v23 }
  0x59   :  { %713 = vmatpush3.bf16.msra.mxu1 %v739_v11  ;;  %397 = vmatpush1.bf16.msra.mxu0 %v756_v24 }
  0x5a   :  { %714 = vmatprep.subr.bf16.mxu1 %v896_v0  ;;  %398 = vmatprep.subr.bf16.mxu0 %v761_v25  ;;  %v298_v0 = vsub.s32 0, %v297_v63 }
  0x5c   :  { %v299_v3 = vrot.slane %v294_v1, %v298_v0 }
  0x5d   :  { %715 = vmatpush3.bf16.msra.mxu1 %v740_v12  ;;  %399 = vmatpush1.bf16.msra.mxu0 %v759_v26 }
  0x5e   :  { %400 = vmatprep.subr.bf16.mxu0 %v764_v35  ;;  %672 = vmatprep.subr.bf16.mxu1 %v765_v38 }
  0x61   :  { %401 = vmatpush1.bf16.msra.mxu0 %v762_v36 }
 0x104   :  { %v157_v28 = vpop.f32.mrf.mxu0 }
 0x105   :  { %v158_v29 = vadd.f32 %v616_v27, %v157_v28 }
 0x106   :  { %v698_v30 = vpop.f32.mrf.mxu0 }
 0x107   :  { %v163_v31 = vmax.f32 %v158_v29, 0.0 }
 0x108   :  { %v160_v32 = vpop.f32.mrf.mxu0 }
 0x109   :  { %v164_v33 = vpack.c.bf16 %v163_v31, %v163_v31 }
 0x10a   :  { %v699_v34 = vpop.f32.mrf.mxu0 }
 0x10b   :  { %717 = vmatmul.mubr.bf16.vlgmr.msra.gmra.mxu1 %v164_v33 }
 0x10c   :  { %673 = vmatpush3.bf16.msra.mxu1 %v766_v39 }
 0x10d   :  { %674 = vmatprep.subr.bf16.mxu1 %v767_v40 }
 0x110   :  { %675 = vmatpush3.bf16.msra.mxu1 %v768_v41 }
 0x111   :  { %676 = vmatprep.subr.bf16.mxu1 %v769_v42 }
 0x114   :  { %677 = vmatpush3.bf16.msra.mxu1 %v770_v43 }
 0x115   :  { %678 = vmatprep.subr.bf16.mxu1 %v771_v44 }
 0x118   :  { %679 = vmatpush3.bf16.msra.mxu1 %v772_v45 }
 0x119   :  { %680 = vmatprep.subr.bf16.mxu1 %v773_v46 }
 0x11c   :  { %681 = vmatpush3.bf16.msra.mxu1 %v774_v47 }
 0x11d   :  { %682 = vmatprep.subr.bf16.mxu1 %v775_v48 }
 0x120   :  { %683 = vmatpush3.bf16.msra.mxu1 %v776_v49 }
 0x121   :  { %684 = vmatprep.subr.bf16.mxu1 %v777_v58 }
 0x124   :  { %685 = vmatpush3.bf16.msra.mxu1 %v778_v59 }
 0x125   :  { %686 = vmatprep.subr.bf16.mxu1 %v779_v60 }
 0x128   :  { %687 = vmatpush3.bf16.msra.mxu1 %v780_v61 }
 0x1cb   :  { %v270_v51 = vpop.f32.mrf.mxu1 }
 0x1cc   :  { %v271_v52 = vadd.f32 %v619_v50, %v270_v51 }
 0x1cd   :  { %v718_v53 = vpop.f32.mrf.mxu1 }
 0x1ce   :  { %v276_v54 = vmax.f32 %v271_v52, 0.0 }
 0x1cf   :  { %v273_v55 = vpop.f32.mrf.mxu1 }
 0x1d0   :  { %v277_v56 = vpack.c.bf16 %v276_v54, %v276_v54 }
 0x1d1   :  { %v719_v57 = vpop.f32.mrf.mxu1 }
 0x1d2   :  { %419 = vmatmul.mubr.bf16.vlgmr.msra.gmra.mxu0 %v277_v56 }
 0x292   :  { %v420_v5 = vpop.f32.mrf.mxu0 }
 0x293   :  { %v421_v6 = vadd.f32 %v420_v5, %v299_v3 }
 0x294   :  { %v422_v7 = vpop.f32.mrf.mxu0 }
 0x295   :  { %v423_v8 = vadd.f32 %v422_v7, %v303_v4  ;;  %v427_v9 = vmax.f32 %v421_v6, 0.0 }
 0x296   :  { %v424_v10 = vpop.f32.mrf.mxu0 }
 0x297   :  { %v428_v11 = vmax.f32 %v423_v8, 0.0  ;;  %v429_v14 = vpack.c.bf16 %v427_v9, %v427_v9 }
 0x298   :  { %v425_v12 = vpop.f32.mrf.mxu0 }
 0x299   :  { %v430_v13 = vpack.c.bf16 %v428_v11, %v428_v11 }
 0x29b   :  { %591 = vmatprep.mubr.bf16.mxu1 %v430_v13 }
 0x29c   :  { %592 = vmatmul.mubr.bf16.vlgmr.msra.gmra.mxu1 %v429_v14 }
 0x35c   :  { %v688_v15 = vpop.f32.mrf.mxu1 }
 0x35e   :  { %v689_v16 = vpop.f32.mrf.mxu1 }
 0x35f   :  { %v690_v18 = vadd.f32 %v689_v16, %v688_v15 }
 0x360   :  { %v691_v19 = vpop.f32.mrf.mxu1 }
 0x361   :  { %v606_v20 = vadd.f32 %v690_v18, %v660_v17 }
 0x362   :  { %v692_v21 = vpop.f32.mrf.mxu1 }
 0x363   :  { %608 = vst.msk [vmem:[%s997_s9] sm:$0xff] %vm607_vm3, %v606_v20 }
 0x364   :  { %613 = vsyncpa [#allocation3], 1 }
 0x365   :  { %614 = vsyncpa [#allocation5], 1 }
 0x366   :  { %615 = vsyncpa [#allocation8], 1 }

</bundles_post_ra>
